<compile_context>
chip_gen: v7x
topology: tpu7x:2x2x1
jax: 0.10.0
libtpu: 0.0.40
codegen_flags: <defaults>
</compile_context>

<pallas_src>
from functools import partial

import jax
import jax.numpy as jnp
from jax.experimental import pallas as pl
from jax.experimental.pallas import tpu as pltpu

EPS = 1e-5
LRELU_SLOPE = 0.2


# ---------------------------------------------------------------------------
# Fused Pallas kernel: both branches (3 units each) + gram matmul, per batch block.
# ---------------------------------------------------------------------------
def _decoder21_kernel(GB, N, x_ref, *refs):
    # refs layout:
    #   [0:12]  6 units x (w, mod)   (branch1 units 1..3, then branch2 units 1..3)
    #           w   : (Cin, Cout)       shared weights (resident across grid steps)
    #           mod : (GB, 2, Cout)     precomputed [gamma; beta] per graph
    #   [-1]    o_ref : (GB, N, N)
    o_ref = refs[-1]
    unit_refs = refs[:-1]
    units = [unit_refs[2 * i : 2 * i + 2] for i in range(6)]
    b1_units, b2_units = units[:3], units[3:]

    def unit(h2d, w_ref, mod_ref):
        cout = w_ref.shape[1]
        # Linear over all GB*N rows at once (bias cancels under InstanceNorm).
        h = jnp.dot(h2d, w_ref[...], preferred_element_type=jnp.float32)
        h3 = h.reshape(GB, N, cout)
        # Per-graph InstanceNorm over the node axis, two-pass stats.
        mean = jnp.mean(h3, axis=1, keepdims=True)
        cent = h3 - mean
        var = jnp.mean(cent * cent, axis=1, keepdims=True)
        hn = cent * jax.lax.rsqrt(var + EPS)
        # AdaIN modulation (gamma/beta precomputed in the wrapper).
        mod = mod_ref[...]                      # (GB, 2, Cout)
        gamma = mod[:, 0:1, :]                  # (GB, 1, Cout) - sublane slice, cheap
        beta = mod[:, 1:2, :]
        out = gamma * hn + beta
        # LeakyReLU(0.2); dropout p=0 -> identity.
        out = jnp.where(out >= 0, out, LRELU_SLOPE * out)
        return out.reshape(GB * N, cout)

    x = x_ref[...]                              # (GB*N, Cin)

    h1 = x
    for w_r, m_r in b1_units:
        h1 = unit(h1, w_r, m_r)

    h2 = x
    for w_r, m_r in b2_units:
        h2 = unit(h2, w_r, m_r)

    h1_3 = h1.reshape(GB, N, h1.shape[-1])
    h2_3 = h2.reshape(GB, N, h2.shape[-1])
    # A[b] = h1[b] @ h2[b]^T as one batched contraction on the last dims.
    # (At N=8 any implicit RHS transpose is a single vreg; revisit if nroi grows.)
    o_ref[...] = jax.lax.dot_general(
        h1_3, h2_3,
        dimension_numbers=(((2,), (2,)), ((0,), (0,))),
        preferred_element_type=jnp.float32,
    )


# ---------------------------------------------------------------------------
# Wrapper
# ---------------------------------------------------------------------------
def _default_batch_blocks(batch_size):
    """Collapse the grid on 1-TC chips; split in two on v7x (2 TensorCores)."""
    try:
        kind = jax.devices()[0].device_kind.lower()
    except Exception:  # pragma: no cover
        kind = ""
    if "v7" in kind and batch_size >= 2 and batch_size % 2 == 0:
        return 2
    return 1


@partial(jax.jit, static_argnames=("batch_size", "nroi", "num_blocks"))
def _decoder21_forward_impl(params, x_flat, style1, style2, *, batch_size, nroi,
                            num_blocks):
    B, N = batch_size, nroi
    Cin = x_flat.shape[-1]
    assert B % num_blocks == 0
    GB = B // num_blocks

    unit_arrays = []
    unit_specs = []
    for branch, style in (("branch1", style1), ("branch2", style2)):
        for p in params[branch]:
            cin, cout = p["w"].shape
            # Hoisted style affine: one (B, style_dim) @ (style_dim, 2*Cout) matmul
            # per unit, done by XLA outside the kernel; split gamma/beta here so the
            # kernel never lane-slices at unaligned offsets.
            gb = style @ p["ws"] + p["bs"]                      # (B, 2*Cout)
            mod = jnp.stack([gb[:, :cout], gb[:, cout:]], axis=1)  # (B, 2, Cout)
            unit_arrays += [p["w"], mod]
            unit_specs += [
                pl.BlockSpec((cin, cout), lambda i: (0, 0)),        # shared weight
                pl.BlockSpec((GB, 2, cout), lambda i: (i, 0, 0)),   # per-graph gamma/beta
            ]

    kernel = partial(_decoder21_kernel, GB, N)

    return pl.pallas_call(
        kernel,
        out_shape=jax.ShapeDtypeStruct((B, N, N), jnp.float32),
        grid=(num_blocks,),
        in_specs=[
            pl.BlockSpec((GB * N, Cin), lambda i: (i, 0)),          # node features
        ] + unit_specs,
        out_specs=pl.BlockSpec((GB, N, N), lambda i: (i, 0, 0)),
        compiler_params=pltpu.CompilerParams(dimension_semantics=("parallel",)),
    )(x_flat, *unit_arrays)


def decoder21_forward(params, x_flat, style1, style2, batch_size, nroi,
                      num_blocks=None):
    """x_flat: (batch_size*nroi, input_size); style*: (batch_size, style_dim)."""
    if num_blocks is None:
        num_blocks = _default_batch_blocks(batch_size)
    return _decoder21_forward_impl(params, x_flat, style1, style2,
                                   batch_size=batch_size, nroi=nroi,
                                   num_blocks=num_blocks)


# ---------------------------------------------------------------------------
# Parameter init (deterministic, synthetic)
# ---------------------------------------------------------------------------
def _init_unit(key, cin, cout, style_dim):
    k1, k2 = jax.random.split(key)
    w = jax.random.normal(k1, (cin, cout), jnp.float32) / jnp.sqrt(cin)
    b = jnp.zeros((1, cout), jnp.float32)  # cancels exactly under InstanceNorm
    ws = jax.random.normal(k2, (style_dim, 2 * cout), jnp.float32) / jnp.sqrt(style_dim)
    # AdaIN convention: gamma bias init 1, beta bias init 0
    bs = jnp.concatenate([jnp.ones((cout,), jnp.float32),
                          jnp.zeros((cout,), jnp.float32)]).reshape(1, 2 * cout)
    return dict(w=w, b=b, ws=ws, bs=bs)


def init_decoder21_params(key, input_size, style_dim):
    keys = jax.random.split(key, 6)
    dims = [(input_size, input_size * 2),
            (input_size * 2, input_size * 4),
            (input_size * 4, input_size * 8)]
    branch1 = [_init_unit(keys[i], ci, co, style_dim) for i, (ci, co) in enumerate(dims)]
    branch2 = [_init_unit(keys[3 + i], ci, co, style_dim) for i, (ci, co) in enumerate(dims)]
    return dict(branch1=branch1, branch2=branch2)


# ---------------------------------------------------------------------------
# Pure-JAX reference (for in-script correctness check)
# ---------------------------------------------------------------------------
def _reference_forward(params, x_flat, style1, style2, batch_size, nroi):
    def unit(h, style, p):
        cout = p["w"].shape[1]
        h = h @ p["w"] + p["b"]
        h3 = h.reshape(batch_size, nroi, cout)
        mean = h3.mean(axis=1, keepdims=True)
        var = ((h3 - mean) ** 2).mean(axis=1, keepdims=True)
        hn = (h3 - mean) / jnp.sqrt(var + EPS)
        gb = style @ p["ws"] + p["bs"]
        gamma = gb[:, :cout][:, None, :]
        beta = gb[:, cout:][:, None, :]
        out = gamma * hn + beta
        out = jnp.where(out >= 0, out, LRELU_SLOPE * out)
        return out.reshape(batch_size * nroi, cout)

    h1, h2 = x_flat, x_flat
    for p in params["branch1"]:
        h1 = unit(h1, style1, p)
    for p in params["branch2"]:
        h2 = unit(h2, style2, p)
    x1 = h1.reshape(batch_size, nroi, -1)
    x2 = h2.reshape(batch_size, nroi, -1)
    return jnp.einsum("bnc,bmc->bnm", x1, x2)


# ---------------------------------------------------------------------------
if __name__ == "__main__":
    input_size = 16
    style_dim = 8
    batch_size = 2
    nroi = 8

    key = jax.random.PRNGKey(0)
    kp, kx, ks1, ks2 = jax.random.split(key, 4)

    params = init_decoder21_params(kp, input_size, style_dim)
    x = jax.random.normal(kx, (batch_size * nroi, input_size), jnp.float32)
    style_vector1 = jax.random.normal(ks1, (batch_size, style_dim), jnp.float32)
    style_vector2 = jax.random.normal(ks2, (batch_size, style_dim), jnp.float32)

    A = decoder21_forward(params, x, style_vector1, style_vector2, batch_size, nroi)
    A = jax.block_until_ready(A)
    assert A.shape == (batch_size, nroi, nroi)
    assert bool(jnp.all(jnp.isfinite(A)))

    A_ref = _reference_forward(params, x, style_vector1, style_vector2,
                               batch_size, nroi)
    err = float(jnp.max(jnp.abs(A - A_ref)))
    assert err < 1e-3, f"mismatch vs reference: max abs err = {err}"

    print("KERNEL_OK")
</pallas_src>

<mosaic_0001>
module attributes {stable_mosaic.version = 11 : i64} {
  func.func @_decoder21_kernel(%arg0: i32, %arg1: memref<16x16xf32, #tpu.memory_space<vmem>>, %arg2: memref<16x32xf32, #tpu.memory_space<vmem>>, %arg3: memref<2x2x32xf32, #tpu.memory_space<vmem>>, %arg4: memref<32x64xf32, #tpu.memory_space<vmem>>, %arg5: memref<2x2x64xf32, #tpu.memory_space<vmem>>, %arg6: memref<64x128xf32, #tpu.memory_space<vmem>>, %arg7: memref<2x2x128xf32, #tpu.memory_space<vmem>>, %arg8: memref<16x32xf32, #tpu.memory_space<vmem>>, %arg9: memref<2x2x32xf32, #tpu.memory_space<vmem>>, %arg10: memref<32x64xf32, #tpu.memory_space<vmem>>, %arg11: memref<2x2x64xf32, #tpu.memory_space<vmem>>, %arg12: memref<64x128xf32, #tpu.memory_space<vmem>>, %arg13: memref<2x2x128xf32, #tpu.memory_space<vmem>>, %arg14: memref<2x8x8xf32, #tpu.memory_space<vmem>>) attributes {dimension_semantics = [#tpu.dimension_semantics<parallel>], iteration_bounds = array<i64: 1>, scalar_prefetch = 0 : i64, scratch_operands = 0 : i64, tpu.core_type = #tpu.core_type<tc>, window_params = [{transform_indices = @transform_0, window_bounds = array<i64: 16, 16>}, {pipeline_mode = #tpu.pipeline_mode<synchronous>, transform_indices = @transform_1, window_bounds = array<i64: 16, 32>}, {transform_indices = @transform_2, window_bounds = array<i64: 2, 2, 32>}, {pipeline_mode = #tpu.pipeline_mode<synchronous>, transform_indices = @transform_3, window_bounds = array<i64: 32, 64>}, {transform_indices = @transform_4, window_bounds = array<i64: 2, 2, 64>}, {pipeline_mode = #tpu.pipeline_mode<synchronous>, transform_indices = @transform_5, window_bounds = array<i64: 64, 128>}, {transform_indices = @transform_6, window_bounds = array<i64: 2, 2, 128>}, {pipeline_mode = #tpu.pipeline_mode<synchronous>, transform_indices = @transform_7, window_bounds = array<i64: 16, 32>}, {transform_indices = @transform_8, window_bounds = array<i64: 2, 2, 32>}, {pipeline_mode = #tpu.pipeline_mode<synchronous>, transform_indices = @transform_9, window_bounds = array<i64: 32, 64>}, {transform_indices = @transform_10, window_bounds = array<i64: 2, 2, 64>}, {pipeline_mode = #tpu.pipeline_mode<synchronous>, transform_indices = @transform_11, window_bounds = array<i64: 64, 128>}, {transform_indices = @transform_12, window_bounds = array<i64: 2, 2, 128>}, {transform_indices = @transform_13, window_bounds = array<i64: 2, 8, 8>}]} {
    %c0 = arith.constant 0 : index
    %c0_0 = arith.constant 0 : index
    %0 = vector.load %arg1[%c0, %c0_0] : memref<16x16xf32, #tpu.memory_space<vmem>>, vector<16x16xf32>
    %c0_1 = arith.constant 0 : index
    %c0_2 = arith.constant 0 : index
    %1 = vector.load %arg2[%c0_1, %c0_2] : memref<16x32xf32, #tpu.memory_space<vmem>>, vector<16x32xf32>
    %cst = arith.constant dense<0.000000e+00> : vector<16x32xf32>
    %2 = tpu.matmul %0, %1, %cst {dimension_numbers = #tpu.dot_dimension_numbers<[1], [0], [0], [1], [0, 0, 1, 1], [], []>} : vector<16x16xf32>, vector<16x32xf32>, vector<16x32xf32> -> vector<16x32xf32>
    %3 = vector.shape_cast %2 : vector<16x32xf32> to vector<2x8x32xf32>
    %cst_3 = arith.constant dense<0.000000e+00> : vector<2x32xf32>
    %4 = vector.multi_reduction <add>, %3, %cst_3 [1] : vector<2x8x32xf32> to vector<2x32xf32>
    %5 = vector.shape_cast %4 : vector<2x32xf32> to vector<2x1x32xf32>
    %cst_4 = arith.constant 8.000000e+00 : f32
    %6 = vector.broadcast %cst_4 : f32 to vector<2x1x32xf32>
    %7 = arith.divf %5, %6 : vector<2x1x32xf32>
    %8 = vector.broadcast %7 : vector<2x1x32xf32> to vector<2x8x32xf32>
    %9 = arith.subf %3, %8 : vector<2x8x32xf32>
    %10 = arith.mulf %9, %9 : vector<2x8x32xf32>
    %cst_5 = arith.constant dense<0.000000e+00> : vector<2x32xf32>
    %11 = vector.multi_reduction <add>, %10, %cst_5 [1] : vector<2x8x32xf32> to vector<2x32xf32>
    %12 = vector.shape_cast %11 : vector<2x32xf32> to vector<2x1x32xf32>
    %cst_6 = arith.constant 8.000000e+00 : f32
    %13 = vector.broadcast %cst_6 : f32 to vector<2x1x32xf32>
    %14 = arith.divf %12, %13 : vector<2x1x32xf32>
    %cst_7 = arith.constant 9.99999974E-6 : f32
    %15 = vector.broadcast %cst_7 : f32 to vector<2x1x32xf32>
    %16 = arith.addf %14, %15 : vector<2x1x32xf32>
    %17 = math.rsqrt %16 : vector<2x1x32xf32>
    %18 = vector.broadcast %17 : vector<2x1x32xf32> to vector<2x8x32xf32>
    %19 = arith.mulf %9, %18 : vector<2x8x32xf32>
    %c0_8 = arith.constant 0 : index
    %c0_9 = arith.constant 0 : index
    %c0_10 = arith.constant 0 : index
    %20 = vector.load %arg3[%c0_8, %c0_9, %c0_10] : memref<2x2x32xf32, #tpu.memory_space<vmem>>, vector<2x2x32xf32>
    %21 = vector.extract_strided_slice %20 {offsets = [0, 0, 0], sizes = [2, 1, 32], strides = [1, 1, 1]} : vector<2x2x32xf32> to vector<2x1x32xf32>
    %22 = vector.extract_strided_slice %20 {offsets = [0, 1, 0], sizes = [2, 1, 32], strides = [1, 1, 1]} : vector<2x2x32xf32> to vector<2x1x32xf32>
    %23 = vector.broadcast %21 : vector<2x1x32xf32> to vector<2x8x32xf32>
    %24 = arith.mulf %23, %19 : vector<2x8x32xf32>
    %25 = vector.broadcast %22 : vector<2x1x32xf32> to vector<2x8x32xf32>
    %26 = arith.addf %24, %25 : vector<2x8x32xf32>
    %cst_11 = arith.constant 0.000000e+00 : f32
    %27 = vector.broadcast %cst_11 : f32 to vector<2x8x32xf32>
    %28 = arith.cmpf oge, %26, %27 : vector<2x8x32xf32>
    %cst_12 = arith.constant 2.000000e-01 : f32
    %29 = vector.broadcast %cst_12 : f32 to vector<2x8x32xf32>
    %30 = arith.mulf %29, %26 : vector<2x8x32xf32>
    %31 = arith.select %28, %26, %30 : vector<2x8x32xi1>, vector<2x8x32xf32>
    %32 = vector.shape_cast %31 : vector<2x8x32xf32> to vector<16x32xf32>
    %c0_13 = arith.constant 0 : index
    %c0_14 = arith.constant 0 : index
    %33 = vector.load %arg4[%c0_13, %c0_14] : memref<32x64xf32, #tpu.memory_space<vmem>>, vector<32x64xf32>
    %cst_15 = arith.constant dense<0.000000e+00> : vector<16x64xf32>
    %34 = tpu.matmul %32, %33, %cst_15 {dimension_numbers = #tpu.dot_dimension_numbers<[1], [0], [0], [1], [0, 0, 1, 1], [], []>} : vector<16x32xf32>, vector<32x64xf32>, vector<16x64xf32> -> vector<16x64xf32>
    %35 = vector.shape_cast %34 : vector<16x64xf32> to vector<2x8x64xf32>
    %cst_16 = arith.constant dense<0.000000e+00> : vector<2x64xf32>
    %36 = vector.multi_reduction <add>, %35, %cst_16 [1] : vector<2x8x64xf32> to vector<2x64xf32>
    %37 = vector.shape_cast %36 : vector<2x64xf32> to vector<2x1x64xf32>
    %cst_17 = arith.constant 8.000000e+00 : f32
    %38 = vector.broadcast %cst_17 : f32 to vector<2x1x64xf32>
    %39 = arith.divf %37, %38 : vector<2x1x64xf32>
    %40 = vector.broadcast %39 : vector<2x1x64xf32> to vector<2x8x64xf32>
    %41 = arith.subf %35, %40 : vector<2x8x64xf32>
    %42 = arith.mulf %41, %41 : vector<2x8x64xf32>
    %cst_18 = arith.constant dense<0.000000e+00> : vector<2x64xf32>
    %43 = vector.multi_reduction <add>, %42, %cst_18 [1] : vector<2x8x64xf32> to vector<2x64xf32>
    %44 = vector.shape_cast %43 : vector<2x64xf32> to vector<2x1x64xf32>
    %cst_19 = arith.constant 8.000000e+00 : f32
    %45 = vector.broadcast %cst_19 : f32 to vector<2x1x64xf32>
    %46 = arith.divf %44, %45 : vector<2x1x64xf32>
    %cst_20 = arith.constant 9.99999974E-6 : f32
    %47 = vector.broadcast %cst_20 : f32 to vector<2x1x64xf32>
    %48 = arith.addf %46, %47 : vector<2x1x64xf32>
    %49 = math.rsqrt %48 : vector<2x1x64xf32>
    %50 = vector.broadcast %49 : vector<2x1x64xf32> to vector<2x8x64xf32>
    %51 = arith.mulf %41, %50 : vector<2x8x64xf32>
    %c0_21 = arith.constant 0 : index
    %c0_22 = arith.constant 0 : index
    %c0_23 = arith.constant 0 : index
    %52 = vector.load %arg5[%c0_21, %c0_22, %c0_23] : memref<2x2x64xf32, #tpu.memory_space<vmem>>, vector<2x2x64xf32>
    %53 = vector.extract_strided_slice %52 {offsets = [0, 0, 0], sizes = [2, 1, 64], strides = [1, 1, 1]} : vector<2x2x64xf32> to vector<2x1x64xf32>
    %54 = vector.extract_strided_slice %52 {offsets = [0, 1, 0], sizes = [2, 1, 64], strides = [1, 1, 1]} : vector<2x2x64xf32> to vector<2x1x64xf32>
    %55 = vector.broadcast %53 : vector<2x1x64xf32> to vector<2x8x64xf32>
    %56 = arith.mulf %55, %51 : vector<2x8x64xf32>
    %57 = vector.broadcast %54 : vector<2x1x64xf32> to vector<2x8x64xf32>
    %58 = arith.addf %56, %57 : vector<2x8x64xf32>
    %cst_24 = arith.constant 0.000000e+00 : f32
    %59 = vector.broadcast %cst_24 : f32 to vector<2x8x64xf32>
    %60 = arith.cmpf oge, %58, %59 : vector<2x8x64xf32>
    %cst_25 = arith.constant 2.000000e-01 : f32
    %61 = vector.broadcast %cst_25 : f32 to vector<2x8x64xf32>
    %62 = arith.mulf %61, %58 : vector<2x8x64xf32>
    %63 = arith.select %60, %58, %62 : vector<2x8x64xi1>, vector<2x8x64xf32>
    %64 = vector.shape_cast %63 : vector<2x8x64xf32> to vector<16x64xf32>
    %c0_26 = arith.constant 0 : index
    %c0_27 = arith.constant 0 : index
    %65 = vector.load %arg6[%c0_26, %c0_27] : memref<64x128xf32, #tpu.memory_space<vmem>>, vector<64x128xf32>
    %cst_28 = arith.constant dense<0.000000e+00> : vector<16x128xf32>
    %66 = tpu.matmul %64, %65, %cst_28 {dimension_numbers = #tpu.dot_dimension_numbers<[1], [0], [0], [1], [0, 0, 1, 1], [], []>} : vector<16x64xf32>, vector<64x128xf32>, vector<16x128xf32> -> vector<16x128xf32>
    %67 = vector.shape_cast %66 : vector<16x128xf32> to vector<2x8x128xf32>
    %cst_29 = arith.constant dense<0.000000e+00> : vector<2x128xf32>
    %68 = vector.multi_reduction <add>, %67, %cst_29 [1] : vector<2x8x128xf32> to vector<2x128xf32>
    %69 = vector.shape_cast %68 : vector<2x128xf32> to vector<2x1x128xf32>
    %cst_30 = arith.constant 8.000000e+00 : f32
    %70 = vector.broadcast %cst_30 : f32 to vector<2x1x128xf32>
    %71 = arith.divf %69, %70 : vector<2x1x128xf32>
    %72 = vector.broadcast %71 : vector<2x1x128xf32> to vector<2x8x128xf32>
    %73 = arith.subf %67, %72 : vector<2x8x128xf32>
    %74 = arith.mulf %73, %73 : vector<2x8x128xf32>
    %cst_31 = arith.constant dense<0.000000e+00> : vector<2x128xf32>
    %75 = vector.multi_reduction <add>, %74, %cst_31 [1] : vector<2x8x128xf32> to vector<2x128xf32>
    %76 = vector.shape_cast %75 : vector<2x128xf32> to vector<2x1x128xf32>
    %cst_32 = arith.constant 8.000000e+00 : f32
    %77 = vector.broadcast %cst_32 : f32 to vector<2x1x128xf32>
    %78 = arith.divf %76, %77 : vector<2x1x128xf32>
    %cst_33 = arith.constant 9.99999974E-6 : f32
    %79 = vector.broadcast %cst_33 : f32 to vector<2x1x128xf32>
    %80 = arith.addf %78, %79 : vector<2x1x128xf32>
    %81 = math.rsqrt %80 : vector<2x1x128xf32>
    %82 = vector.broadcast %81 : vector<2x1x128xf32> to vector<2x8x128xf32>
    %83 = arith.mulf %73, %82 : vector<2x8x128xf32>
    %c0_34 = arith.constant 0 : index
    %c0_35 = arith.constant 0 : index
    %c0_36 = arith.constant 0 : index
    %84 = vector.load %arg7[%c0_34, %c0_35, %c0_36] : memref<2x2x128xf32, #tpu.memory_space<vmem>>, vector<2x2x128xf32>
    %85 = vector.extract_strided_slice %84 {offsets = [0, 0, 0], sizes = [2, 1, 128], strides = [1, 1, 1]} : vector<2x2x128xf32> to vector<2x1x128xf32>
    %86 = vector.extract_strided_slice %84 {offsets = [0, 1, 0], sizes = [2, 1, 128], strides = [1, 1, 1]} : vector<2x2x128xf32> to vector<2x1x128xf32>
    %87 = vector.broadcast %85 : vector<2x1x128xf32> to vector<2x8x128xf32>
    %88 = arith.mulf %87, %83 : vector<2x8x128xf32>
    %89 = vector.broadcast %86 : vector<2x1x128xf32> to vector<2x8x128xf32>
    %90 = arith.addf %88, %89 : vector<2x8x128xf32>
    %cst_37 = arith.constant 0.000000e+00 : f32
    %91 = vector.broadcast %cst_37 : f32 to vector<2x8x128xf32>
    %92 = arith.cmpf oge, %90, %91 : vector<2x8x128xf32>
    %cst_38 = arith.constant 2.000000e-01 : f32
    %93 = vector.broadcast %cst_38 : f32 to vector<2x8x128xf32>
    %94 = arith.mulf %93, %90 : vector<2x8x128xf32>
    %95 = arith.select %92, %90, %94 : vector<2x8x128xi1>, vector<2x8x128xf32>
    %96 = vector.shape_cast %95 : vector<2x8x128xf32> to vector<16x128xf32>
    %c0_39 = arith.constant 0 : index
    %c0_40 = arith.constant 0 : index
    %97 = vector.load %arg8[%c0_39, %c0_40] : memref<16x32xf32, #tpu.memory_space<vmem>>, vector<16x32xf32>
    %cst_41 = arith.constant dense<0.000000e+00> : vector<16x32xf32>
    %98 = tpu.matmul %0, %97, %cst_41 {dimension_numbers = #tpu.dot_dimension_numbers<[1], [0], [0], [1], [0, 0, 1, 1], [], []>} : vector<16x16xf32>, vector<16x32xf32>, vector<16x32xf32> -> vector<16x32xf32>
    %99 = vector.shape_cast %98 : vector<16x32xf32> to vector<2x8x32xf32>
    %cst_42 = arith.constant dense<0.000000e+00> : vector<2x32xf32>
    %100 = vector.multi_reduction <add>, %99, %cst_42 [1] : vector<2x8x32xf32> to vector<2x32xf32>
    %101 = vector.shape_cast %100 : vector<2x32xf32> to vector<2x1x32xf32>
    %cst_43 = arith.constant 8.000000e+00 : f32
    %102 = vector.broadcast %cst_43 : f32 to vector<2x1x32xf32>
    %103 = arith.divf %101, %102 : vector<2x1x32xf32>
    %104 = vector.broadcast %103 : vector<2x1x32xf32> to vector<2x8x32xf32>
    %105 = arith.subf %99, %104 : vector<2x8x32xf32>
    %106 = arith.mulf %105, %105 : vector<2x8x32xf32>
    %cst_44 = arith.constant dense<0.000000e+00> : vector<2x32xf32>
    %107 = vector.multi_reduction <add>, %106, %cst_44 [1] : vector<2x8x32xf32> to vector<2x32xf32>
    %108 = vector.shape_cast %107 : vector<2x32xf32> to vector<2x1x32xf32>
    %cst_45 = arith.constant 8.000000e+00 : f32
    %109 = vector.broadcast %cst_45 : f32 to vector<2x1x32xf32>
    %110 = arith.divf %108, %109 : vector<2x1x32xf32>
    %cst_46 = arith.constant 9.99999974E-6 : f32
    %111 = vector.broadcast %cst_46 : f32 to vector<2x1x32xf32>
    %112 = arith.addf %110, %111 : vector<2x1x32xf32>
    %113 = math.rsqrt %112 : vector<2x1x32xf32>
    %114 = vector.broadcast %113 : vector<2x1x32xf32> to vector<2x8x32xf32>
    %115 = arith.mulf %105, %114 : vector<2x8x32xf32>
    %c0_47 = arith.constant 0 : index
    %c0_48 = arith.constant 0 : index
    %c0_49 = arith.constant 0 : index
    %116 = vector.load %arg9[%c0_47, %c0_48, %c0_49] : memref<2x2x32xf32, #tpu.memory_space<vmem>>, vector<2x2x32xf32>
    %117 = vector.extract_strided_slice %116 {offsets = [0, 0, 0], sizes = [2, 1, 32], strides = [1, 1, 1]} : vector<2x2x32xf32> to vector<2x1x32xf32>
    %118 = vector.extract_strided_slice %116 {offsets = [0, 1, 0], sizes = [2, 1, 32], strides = [1, 1, 1]} : vector<2x2x32xf32> to vector<2x1x32xf32>
    %119 = vector.broadcast %117 : vector<2x1x32xf32> to vector<2x8x32xf32>
    %120 = arith.mulf %119, %115 : vector<2x8x32xf32>
    %121 = vector.broadcast %118 : vector<2x1x32xf32> to vector<2x8x32xf32>
    %122 = arith.addf %120, %121 : vector<2x8x32xf32>
    %cst_50 = arith.constant 0.000000e+00 : f32
    %123 = vector.broadcast %cst_50 : f32 to vector<2x8x32xf32>
    %124 = arith.cmpf oge, %122, %123 : vector<2x8x32xf32>
    %cst_51 = arith.constant 2.000000e-01 : f32
    %125 = vector.broadcast %cst_51 : f32 to vector<2x8x32xf32>
    %126 = arith.mulf %125, %122 : vector<2x8x32xf32>
    %127 = arith.select %124, %122, %126 : vector<2x8x32xi1>, vector<2x8x32xf32>
    %128 = vector.shape_cast %127 : vector<2x8x32xf32> to vector<16x32xf32>
    %c0_52 = arith.constant 0 : index
    %c0_53 = arith.constant 0 : index
    %129 = vector.load %arg10[%c0_52, %c0_53] : memref<32x64xf32, #tpu.memory_space<vmem>>, vector<32x64xf32>
    %cst_54 = arith.constant dense<0.000000e+00> : vector<16x64xf32>
    %130 = tpu.matmul %128, %129, %cst_54 {dimension_numbers = #tpu.dot_dimension_numbers<[1], [0], [0], [1], [0, 0, 1, 1], [], []>} : vector<16x32xf32>, vector<32x64xf32>, vector<16x64xf32> -> vector<16x64xf32>
    %131 = vector.shape_cast %130 : vector<16x64xf32> to vector<2x8x64xf32>
    %cst_55 = arith.constant dense<0.000000e+00> : vector<2x64xf32>
    %132 = vector.multi_reduction <add>, %131, %cst_55 [1] : vector<2x8x64xf32> to vector<2x64xf32>
    %133 = vector.shape_cast %132 : vector<2x64xf32> to vector<2x1x64xf32>
    %cst_56 = arith.constant 8.000000e+00 : f32
    %134 = vector.broadcast %cst_56 : f32 to vector<2x1x64xf32>
    %135 = arith.divf %133, %134 : vector<2x1x64xf32>
    %136 = vector.broadcast %135 : vector<2x1x64xf32> to vector<2x8x64xf32>
    %137 = arith.subf %131, %136 : vector<2x8x64xf32>
    %138 = arith.mulf %137, %137 : vector<2x8x64xf32>
    %cst_57 = arith.constant dense<0.000000e+00> : vector<2x64xf32>
    %139 = vector.multi_reduction <add>, %138, %cst_57 [1] : vector<2x8x64xf32> to vector<2x64xf32>
    %140 = vector.shape_cast %139 : vector<2x64xf32> to vector<2x1x64xf32>
    %cst_58 = arith.constant 8.000000e+00 : f32
    %141 = vector.broadcast %cst_58 : f32 to vector<2x1x64xf32>
    %142 = arith.divf %140, %141 : vector<2x1x64xf32>
    %cst_59 = arith.constant 9.99999974E-6 : f32
    %143 = vector.broadcast %cst_59 : f32 to vector<2x1x64xf32>
    %144 = arith.addf %142, %143 : vector<2x1x64xf32>
    %145 = math.rsqrt %144 : vector<2x1x64xf32>
    %146 = vector.broadcast %145 : vector<2x1x64xf32> to vector<2x8x64xf32>
    %147 = arith.mulf %137, %146 : vector<2x8x64xf32>
    %c0_60 = arith.constant 0 : index
    %c0_61 = arith.constant 0 : index
    %c0_62 = arith.constant 0 : index
    %148 = vector.load %arg11[%c0_60, %c0_61, %c0_62] : memref<2x2x64xf32, #tpu.memory_space<vmem>>, vector<2x2x64xf32>
    %149 = vector.extract_strided_slice %148 {offsets = [0, 0, 0], sizes = [2, 1, 64], strides = [1, 1, 1]} : vector<2x2x64xf32> to vector<2x1x64xf32>
    %150 = vector.extract_strided_slice %148 {offsets = [0, 1, 0], sizes = [2, 1, 64], strides = [1, 1, 1]} : vector<2x2x64xf32> to vector<2x1x64xf32>
    %151 = vector.broadcast %149 : vector<2x1x64xf32> to vector<2x8x64xf32>
    %152 = arith.mulf %151, %147 : vector<2x8x64xf32>
    %153 = vector.broadcast %150 : vector<2x1x64xf32> to vector<2x8x64xf32>
    %154 = arith.addf %152, %153 : vector<2x8x64xf32>
    %cst_63 = arith.constant 0.000000e+00 : f32
    %155 = vector.broadcast %cst_63 : f32 to vector<2x8x64xf32>
    %156 = arith.cmpf oge, %154, %155 : vector<2x8x64xf32>
    %cst_64 = arith.constant 2.000000e-01 : f32
    %157 = vector.broadcast %cst_64 : f32 to vector<2x8x64xf32>
    %158 = arith.mulf %157, %154 : vector<2x8x64xf32>
    %159 = arith.select %156, %154, %158 : vector<2x8x64xi1>, vector<2x8x64xf32>
    %160 = vector.shape_cast %159 : vector<2x8x64xf32> to vector<16x64xf32>
    %c0_65 = arith.constant 0 : index
    %c0_66 = arith.constant 0 : index
    %161 = vector.load %arg12[%c0_65, %c0_66] : memref<64x128xf32, #tpu.memory_space<vmem>>, vector<64x128xf32>
    %cst_67 = arith.constant dense<0.000000e+00> : vector<16x128xf32>
    %162 = tpu.matmul %160, %161, %cst_67 {dimension_numbers = #tpu.dot_dimension_numbers<[1], [0], [0], [1], [0, 0, 1, 1], [], []>} : vector<16x64xf32>, vector<64x128xf32>, vector<16x128xf32> -> vector<16x128xf32>
    %163 = vector.shape_cast %162 : vector<16x128xf32> to vector<2x8x128xf32>
    %cst_68 = arith.constant dense<0.000000e+00> : vector<2x128xf32>
    %164 = vector.multi_reduction <add>, %163, %cst_68 [1] : vector<2x8x128xf32> to vector<2x128xf32>
    %165 = vector.shape_cast %164 : vector<2x128xf32> to vector<2x1x128xf32>
    %cst_69 = arith.constant 8.000000e+00 : f32
    %166 = vector.broadcast %cst_69 : f32 to vector<2x1x128xf32>
    %167 = arith.divf %165, %166 : vector<2x1x128xf32>
    %168 = vector.broadcast %167 : vector<2x1x128xf32> to vector<2x8x128xf32>
    %169 = arith.subf %163, %168 : vector<2x8x128xf32>
    %170 = arith.mulf %169, %169 : vector<2x8x128xf32>
    %cst_70 = arith.constant dense<0.000000e+00> : vector<2x128xf32>
    %171 = vector.multi_reduction <add>, %170, %cst_70 [1] : vector<2x8x128xf32> to vector<2x128xf32>
    %172 = vector.shape_cast %171 : vector<2x128xf32> to vector<2x1x128xf32>
    %cst_71 = arith.constant 8.000000e+00 : f32
    %173 = vector.broadcast %cst_71 : f32 to vector<2x1x128xf32>
    %174 = arith.divf %172, %173 : vector<2x1x128xf32>
    %cst_72 = arith.constant 9.99999974E-6 : f32
    %175 = vector.broadcast %cst_72 : f32 to vector<2x1x128xf32>
    %176 = arith.addf %174, %175 : vector<2x1x128xf32>
    %177 = math.rsqrt %176 : vector<2x1x128xf32>
    %178 = vector.broadcast %177 : vector<2x1x128xf32> to vector<2x8x128xf32>
    %179 = arith.mulf %169, %178 : vector<2x8x128xf32>
    %c0_73 = arith.constant 0 : index
    %c0_74 = arith.constant 0 : index
    %c0_75 = arith.constant 0 : index
    %180 = vector.load %arg13[%c0_73, %c0_74, %c0_75] : memref<2x2x128xf32, #tpu.memory_space<vmem>>, vector<2x2x128xf32>
    %181 = vector.extract_strided_slice %180 {offsets = [0, 0, 0], sizes = [2, 1, 128], strides = [1, 1, 1]} : vector<2x2x128xf32> to vector<2x1x128xf32>
    %182 = vector.extract_strided_slice %180 {offsets = [0, 1, 0], sizes = [2, 1, 128], strides = [1, 1, 1]} : vector<2x2x128xf32> to vector<2x1x128xf32>
    %183 = vector.broadcast %181 : vector<2x1x128xf32> to vector<2x8x128xf32>
    %184 = arith.mulf %183, %179 : vector<2x8x128xf32>
    %185 = vector.broadcast %182 : vector<2x1x128xf32> to vector<2x8x128xf32>
    %186 = arith.addf %184, %185 : vector<2x8x128xf32>
    %cst_76 = arith.constant 0.000000e+00 : f32
    %187 = vector.broadcast %cst_76 : f32 to vector<2x8x128xf32>
    %188 = arith.cmpf oge, %186, %187 : vector<2x8x128xf32>
    %cst_77 = arith.constant 2.000000e-01 : f32
    %189 = vector.broadcast %cst_77 : f32 to vector<2x8x128xf32>
    %190 = arith.mulf %189, %186 : vector<2x8x128xf32>
    %191 = arith.select %188, %186, %190 : vector<2x8x128xi1>, vector<2x8x128xf32>
    %192 = vector.shape_cast %191 : vector<2x8x128xf32> to vector<16x128xf32>
    %193 = vector.shape_cast %96 : vector<16x128xf32> to vector<2x8x128xf32>
    %194 = vector.shape_cast %192 : vector<16x128xf32> to vector<2x8x128xf32>
    %cst_78 = arith.constant dense<0.000000e+00> : vector<2x8x8xf32>
    %195 = tpu.matmul %193, %194, %cst_78 {dimension_numbers = #tpu.dot_dimension_numbers<[2], [2], [1], [1], [0, 0, 0, 1, 1, 1], [0], [0]>} : vector<2x8x128xf32>, vector<2x8x128xf32>, vector<2x8x8xf32> -> vector<2x8x8xf32>
    %c0_79 = arith.constant 0 : index
    %c0_80 = arith.constant 0 : index
    %c0_81 = arith.constant 0 : index
    %196 = vector.load %arg14[%c0_79, %c0_80, %c0_81] : memref<2x8x8xf32, #tpu.memory_space<vmem>>, vector<2x8x8xf32>
    tpu.vector_store %arg14[%c0_79, %c0_80, %c0_81], %195 {strides = array<i32>} : memref<2x8x8xf32, #tpu.memory_space<vmem>>, vector<2x8x8xf32>,
    return
  }
  func.func @transform_0(%arg0: i32) -> (i32, i32) {
    %c0_i32 = arith.constant 0 : i32
    %c0_i32_0 = arith.constant 0 : i32
    return %arg0, %c0_i32 : i32, i32
  }
  func.func @transform_1(%arg0: i32) -> (i32, i32) {
    %c0_i32 = arith.constant 0 : i32
    %c0_i32_0 = arith.constant 0 : i32
    %c0_i32_1 = arith.constant 0 : i32
    return %c0_i32, %c0_i32_0 : i32, i32
  }
  func.func @transform_2(%arg0: i32) -> (i32, i32, i32) {
    %c0_i32 = arith.constant 0 : i32
    %c0_i32_0 = arith.constant 0 : i32
    %c0_i32_1 = arith.constant 0 : i32
    return %arg0, %c0_i32, %c0_i32_0 : i32, i32, i32
  }
  func.func @transform_3(%arg0: i32) -> (i32, i32) {
    %c0_i32 = arith.constant 0 : i32
    %c0_i32_0 = arith.constant 0 : i32
    %c0_i32_1 = arith.constant 0 : i32
    return %c0_i32, %c0_i32_0 : i32, i32
  }
  func.func @transform_4(%arg0: i32) -> (i32, i32, i32) {
    %c0_i32 = arith.constant 0 : i32
    %c0_i32_0 = arith.constant 0 : i32
    %c0_i32_1 = arith.constant 0 : i32
    return %arg0, %c0_i32, %c0_i32_0 : i32, i32, i32
  }
  func.func @transform_5(%arg0: i32) -> (i32, i32) {
    %c0_i32 = arith.constant 0 : i32
    %c0_i32_0 = arith.constant 0 : i32
    %c0_i32_1 = arith.constant 0 : i32
    return %c0_i32, %c0_i32_0 : i32, i32
  }
  func.func @transform_6(%arg0: i32) -> (i32, i32, i32) {
    %c0_i32 = arith.constant 0 : i32
    %c0_i32_0 = arith.constant 0 : i32
    %c0_i32_1 = arith.constant 0 : i32
    return %arg0, %c0_i32, %c0_i32_0 : i32, i32, i32
  }
  func.func @transform_7(%arg0: i32) -> (i32, i32) {
    %c0_i32 = arith.constant 0 : i32
    %c0_i32_0 = arith.constant 0 : i32
    %c0_i32_1 = arith.constant 0 : i32
    return %c0_i32, %c0_i32_0 : i32, i32
  }
  func.func @transform_8(%arg0: i32) -> (i32, i32, i32) {
    %c0_i32 = arith.constant 0 : i32
    %c0_i32_0 = arith.constant 0 : i32
    %c0_i32_1 = arith.constant 0 : i32
    return %arg0, %c0_i32, %c0_i32_0 : i32, i32, i32
  }
  func.func @transform_9(%arg0: i32) -> (i32, i32) {
    %c0_i32 = arith.constant 0 : i32
    %c0_i32_0 = arith.constant 0 : i32
    %c0_i32_1 = arith.constant 0 : i32
    return %c0_i32, %c0_i32_0 : i32, i32
  }
  func.func @transform_10(%arg0: i32) -> (i32, i32, i32) {
    %c0_i32 = arith.constant 0 : i32
    %c0_i32_0 = arith.constant 0 : i32
    %c0_i32_1 = arith.constant 0 : i32
    return %arg0, %c0_i32, %c0_i32_0 : i32, i32, i32
  }
  func.func @transform_11(%arg0: i32) -> (i32, i32) {
    %c0_i32 = arith.constant 0 : i32
    %c0_i32_0 = arith.constant 0 : i32
    %c0_i32_1 = arith.constant 0 : i32
    return %c0_i32, %c0_i32_0 : i32, i32
  }
  func.func @transform_12(%arg0: i32) -> (i32, i32, i32) {
    %c0_i32 = arith.constant 0 : i32
    %c0_i32_0 = arith.constant 0 : i32
    %c0_i32_1 = arith.constant 0 : i32
    return %arg0, %c0_i32, %c0_i32_0 : i32, i32, i32
  }
  func.func @transform_13(%arg0: i32) -> (i32, i32, i32) {
    %c0_i32 = arith.constant 0 : i32
    %c0_i32_0 = arith.constant 0 : i32
    %c0_i32_1 = arith.constant 0 : i32
    return %arg0, %c0_i32, %c0_i32_0 : i32, i32, i32
  }
}

</mosaic_0001>

<bundles_post_ra>
// kernel: _decoder21_forward_impl.1
= control target key start
LH: loop header
LB: loop body
LE: loop exit
PB: predicated region body
PF: predicated region fallthrough
CT: control target
= control target key end

     0   :  { %vm49_vm0 = vcmask 130048   ;;  %s1686_s0 = inlined_call_operand.vmem [shape: f32[16,16], index: 0, kind: input, shape index: {}]   ;;  %s1687_s1 = inlined_call_operand.vmem [shape: f32[16,32], index: 1, kind: input, shape index: {}]   ;;  %s1688_s2 = inlined_call_operand.vmem [shape: f32[2,2,32], index: 2, kind: input, shape index: {}]   ;;  %s1689_s3 = inlined_call_operand.vmem [shape: f32[32,64], index: 3, kind: input, shape index: {}]   ;;  %s1690_s4 = inlined_call_operand.vmem [shape: f32[2,2,64], index: 4, kind: input, shape index: {}]   ;;  %s1691_s5 = inlined_call_operand.vmem [shape: f32[64,128], index: 5, kind: input, shape index: {}]   ;;  %s1692_s6 = inlined_call_operand.vmem [shape: f32[2,2,128], index: 6, kind: input, shape index: {}]   ;;  %s1693_s7 = inlined_call_operand.vmem [shape: f32[16,32], index: 7, kind: input, shape index: {}]   ;;  %s1694_s8 = inlined_call_operand.vmem [shape: f32[2,2,32], index: 8, kind: input, shape index: {}]   ;;  %s1695_s9 = inlined_call_operand.vmem [shape: f32[32,64], index: 9, kind: input, shape index: {}]   ;;  %s1696_s10 = inlined_call_operand.vmem [shape: f32[2,2,64], index: 10, kind: input, shape index: {}]   ;;  %s1697_s11 = inlined_call_operand.vmem [shape: f32[64,128], index: 11, kind: input, shape index: {}]   ;;  %s1698_s12 = inlined_call_operand.vmem [shape: f32[2,2,128], index: 12, kind: input, shape index: {}]   ;;  %s1699_s13 = inlined_call_operand.hbm [shape: f32[2,8,8], index: 13, kind: output, shape index: {}]  }
   0x1   :  { %v47_v0 = vld [vmem:[%s1687_s1] sm:$0xff]  ;;  %v48_v1 = vld [vmem:[%s1687_s1 + $0x8] sm:$0xff] }
   0x2   :  { %v1463_v2 = vld [vmem:[%s1686_s0] sm:$0xff]  ;;  %v1270_v3 = vpack.c.bf16 %v48_v1, %v47_v0 }
   0x3   :  { %1190 = vmatprep.mubr.msk.f32.mxu1 %vm49_vm0, %v1463_v2 }
   0x4   :  { %18 = vsyncpa [#allocation3], 0  ;;  %1271 = vmatprep.subr.bf16.mxu1 %v1270_v3  ;;  %v1470_v4 = vld [vmem:[%s1686_s0 + $0x8] sm:$0xff]  ;;  %v203_v5 = vld [vmem:[%s1689_s3] sm:$0xff]  ;;  %vm131_vm1 = vcmask 261120   ;;  %v177_v51 = vlaneseq  ;;  %vm288_vm4 = vcmask 523264  }
   0x5   :  { %1273 = vmatpush3.bf16.msra.mxu1 %v1270_v3  ;;  %v204_v6 = vld [vmem:[%s1689_s3 + $0x8] sm:$0xff]  ;;  %v205_v8 = vld [vmem:[%s1689_s3 + $0x10] sm:$0xff]  ;;  %v206_v9 = vld [vmem:[%s1689_s3 + $0x18] sm:$0xff]  ;;  %vm1380_vm11 = vmmov 0  }
   0x6   :  { %v1274_v7 = vpack.c.bf16 %v204_v6, %v203_v5  ;;  %v1278_v10 = vpack.c.bf16 %v206_v9, %v205_v8  ;;  %v514_v11 = vld [vmem:[%s1693_s7] sm:$0xff]  ;;  %v515_v12 = vld [vmem:[%s1693_s7 + $0x8] sm:$0xff]  ;;  %v178_v55 = vshrl.u32 %v177_v51, 7 }
   0x7   :  { %v1492_v13 = vpack.c.bf16 %v515_v12, %v514_v11  ;;  %v176_v57 = vld [vmem:[%s1688_s2 + $0x2] sm:$0x3]  ;;  %v175_v59 = vld [vmem:[%s1688_s2] sm:$0x3] }
   0x8   :  { %1191 = vmatmul.mubr.msk.f32.vlgmr.msra.gmra.mrb[0].mxu1 %vm49_vm0, %v1470_v4  ;;  %1275 = vmatprep.subr.bf16.mxu1 %v1274_v7  ;;  %v1499_v56 = vsub.s32 0, %v178_v55  ;;  %v1504_v58 = vsub.s32 1, %v178_v55 }
   0x9   :  { %1277 = vmatpush3.bf16.msra.mxu1 %v1274_v7 }
   0xa   :  { %1279 = vmatprep.subr.bf16.mxu1 %v1278_v10  ;;  %v184_v60 = vrot.slane %v176_v57, %v1499_v56  ;;  %v180_v62 = vrot.slane %v175_v59, %v1499_v56  ;;  %v194_v1 = vrot.slane %v176_v57, %v1504_v58  ;;  %v190_v5 = vrot.slane %v175_v59, %v1504_v58 }
   0xd   :  { %1281 = vmatpush3.bf16.msra.mxu1 %v1278_v10 }
   0xe   :  { %1299 = vmatprep.subr.bf16.mxu1 %v1492_v13 }
  0xdb   :  { %v1192_v14 = vpop.f32.mrb[0].mxu1 }
  0xdc   :  { %v139_v15 = vsel %vm131_vm1, %v1192_v14, 0.0  ;;  %v122_v16 = vpop.f32.mrb[1].mxu1 }
  0xdd   :  { %v140_v17 = vrot.slane %v139_v15, 4  ;;  %v132_v18 = vsel %vm131_vm1, %v122_v16, 0.0 }
  0xde   :  { %v133_v19 = vrot.slane %v132_v18, 4 }
  0xdf   :  { %v141_v20 = vadd.f32 %v140_v17, %v139_v15  ;;  %v359_v15 = vld [vmem:[%s1691_s5] sm:$0xff] }
  0xe0   :  { %v134_v21 = vadd.f32 %v133_v19, %v132_v18  ;;  %v363_v18 = vld [vmem:[%s1691_s5 + $0x20] sm:$0xff]  ;;  %v364_v19 = vld [vmem:[%s1691_s5 + $0x28] sm:$0xff] }
  0xe1   :  { %v142_v22 = vrot.slane %v141_v20, 2 }
  0xe2   :  { %v135_v23 = vrot.slane %v134_v21, 2 }
  0xe3   :  { %v143_v24 = vadd.f32 %v142_v22, %v141_v20  ;;  %v1290_v20 = vpack.c.bf16 %v364_v19, %v363_v18  ;;  %v366_v22 = vld [vmem:[%s1691_s5 + $0x38] sm:$0xff] }
  0xe4   :  { %v136_v25 = vadd.f32 %v135_v23, %v134_v21  ;;  %v365_v21 = vld [vmem:[%s1691_s5 + $0x30] sm:$0xff] }
  0xe5   :  { %v144_v26 = vrot.slane %v143_v24, 1  ;;  %v1294_v23 = vpack.c.bf16 %v366_v22, %v365_v21 }
  0xe6   :  { %v137_v27 = vrot.slane %v136_v25, 1 }
  0xe7   :  { %v145_v28 = vadd.f32 %v144_v26, %v143_v24  ;;  %v661_v24 = vld [vmem:[%s1695_s9] sm:$0xff] }
  0xe8   :  { %v138_v29 = vadd.f32 %v137_v27, %v136_v25  ;;  %v662_v25 = vld [vmem:[%s1695_s9 + $0x8] sm:$0xff]  ;;  %v663_v27 = vld [vmem:[%s1695_s9 + $0x10] sm:$0xff] }
  0xe9   :  { %v148_v30 = vmul.f32 0.125, %v145_v28  ;;  %v1302_v26 = vpack.c.bf16 %v662_v25, %v661_v24  ;;  %v664_v28 = vld [vmem:[%s1695_s9 + $0x18] sm:$0xff] }
  0xea   :  { %v147_v31 = vmul.f32 0.125, %v138_v29  ;;  %v1306_v29 = vpack.c.bf16 %v664_v28, %v663_v27 }
  0xeb   :  { %v150_v32 = vsub.f32 %v1192_v14, %v148_v30 }
  0xec   :  { %v149_v33 = vsub.f32 %v122_v16, %v147_v31  ;;  %v360_v16 = vld [vmem:[%s1691_s5 + $0x8] sm:$0xff] }
  0xed   :  { %v152_v34 = vmul.f32 %v150_v32, %v150_v32  ;;  %v1282_v17 = vpack.c.bf16 %v360_v16, %v359_v15 }
  0xee   :  { %v151_v35 = vmul.f32 %v149_v33, %v149_v33 }
  0xef   :  { %v160_v36 = vsel %vm131_vm1, %v152_v34, 0.0  ;;  %1283 = vmatprep.subr.bf16.mxu0 %v1282_v17 }
  0xf0   :  { %v161_v37 = vrot.slane %v160_v36, 4  ;;  %v153_v38 = vsel %vm131_vm1, %v151_v35, 0.0  ;;  %1285 = vmatpush3.bf16.msra.mxu0 %v1282_v17 }
  0xf1   :  { %v154_v39 = vrot.slane %v153_v38, 4 }
  0xf2   :  { %v162_v40 = vadd.f32 %v161_v37, %v160_v36 }
  0xf3   :  { %v155_v41 = vadd.f32 %v154_v39, %v153_v38 }
  0xf4   :  { %v163_v42 = vrot.slane %v162_v40, 2 }
  0xf5   :  { %v156_v43 = vrot.slane %v155_v41, 2 }
  0xf6   :  { %v164_v44 = vadd.f32 %v163_v42, %v162_v40 }
  0xf7   :  { %v157_v45 = vadd.f32 %v156_v43, %v155_v41 }
  0xf8   :  { %v165_v46 = vrot.slane %v164_v44, 1 }
  0xf9   :  { %v158_v47 = vrot.slane %v157_v45, 1 }
  0xfa   :  { %v166_v48 = vadd.f32 %v165_v46, %v164_v44 }
  0xfb   :  { %v159_v49 = vadd.f32 %v158_v47, %v157_v45 }
  0xfc   :  { %v168_v50 = vmul.f32 0.125, %v166_v48 }
  0xfd   :  { %v167_v52 = vmul.f32 0.125, %v159_v49 }
  0xfe   :  { %v170_v53 = vadd.f32 1e-05, %v168_v50 }
  0xff   :  { %v169_v54 = vadd.f32 1e-05, %v167_v52 }
 0x100   :  { %1331 = vrsqrt.f32 %v170_v53 }
 0x101   :  { %1333 = vrsqrt.f32 %v169_v54 }
 0x10a   :  { %v1332_v61 = vpop.eup %1331 }
 0x10b   :  { %v1334_v63 = vpop.eup %1333  ;;  %v174_v0 = vmul.f32 %v1332_v61, %v150_v32 }
 0x10c   :  { %v173_v3 = vmul.f32 %v1334_v63, %v149_v33 }
 0x10d   :  { %v186_v6 = vmul.f32 %v184_v60, %v174_v0 }
 0x10e   :  { %v185_v7 = vmul.f32 %v180_v62, %v173_v3 }
 0x10f   :  { %v196_v8 = vadd.f32 %v194_v1, %v186_v6 }
 0x110   :  { %v195_v9 = vadd.f32 %v190_v5, %v185_v7 }
 0x111   :  { %v200_v10 = vmul.f32 0.2, %v196_v8  ;;  %vm198_vm3 = vcmp.ge.f32.partialorder %v196_v8, 0.0 }
 0x112   :  { %vm197_vm2 = vcmp.ge.f32.partialorder %v195_v9, 0.0  ;;  %v199_v11 = vmul.f32 0.2, %v195_v9 }
 0x113   :  { %v202_v14 = vsel %vm198_vm3, %v196_v8, %v200_v10 }
 0x114   :  { %v201_v12 = vsel %vm197_vm2, %v195_v9, %v199_v11 }
 0x115   :  { %1201 = vmatprep.mubr.msk.f32.mxu1 %vm131_vm1, %v201_v12 }
 0x116   :  { %1202 = vmatmul.mubr.msk.f32.vlgmr.msra.gmra.mrb[2].mxu1 %vm131_vm1, %v202_v14 }
 0x117   :  { %1301 = vmatpush3.bf16.msra.mxu1 %v1492_v13  ;;  %1227 = vmatprep.mubr.msk.f32.mxu1 %vm49_vm0, %v1463_v2  ;;  %v361_v13 = vld [vmem:[%s1691_s5 + $0x10] sm:$0xff]  ;;  %v362_v2 = vld [vmem:[%s1691_s5 + $0x18] sm:$0xff] }
 0x118   :  { %1303 = vmatprep.subr.bf16.mxu1 %v1302_v26 }
 0x11a   :  { %1228 = vmatmul.mubr.msk.f32.vlgmr.msra.gmra.mrb[4].mxu1 %vm49_vm0, %v1470_v4  ;;  %v1286_v4 = vpack.c.bf16 %v362_v2, %v361_v13  ;;  %vm1111_vm0 = vcmask 64512  }
 0x11b   :  { %1305 = vmatpush3.bf16.msra.mxu1 %v1302_v26 }
 0x11c   :  { %1287 = vmatprep.subr.bf16.mxu0 %v1286_v4  ;;  %1307 = vmatprep.subr.bf16.mxu1 %v1306_v29 }
 0x11d   :  { %1289 = vmatpush3.bf16.msra.mxu0 %v1286_v4 }
 0x11e   :  { %1291 = vmatprep.subr.bf16.mxu0 %v1290_v20 }
 0x11f   :  { %1309 = vmatpush3.bf16.msra.mxu1 %v1306_v29 }
 0x121   :  { %1293 = vmatpush3.bf16.msra.mxu0 %v1290_v20 }
 0x122   :  { %1295 = vmatprep.subr.bf16.mxu0 %v1294_v23 }
 0x125   :  { %1297 = vmatpush3.bf16.msra.mxu0 %v1294_v23 }
 0x1e9   :  { %v1203_v30 = vpop.f32.mrb[2].mxu1 }
 0x1ea   :  { %v296_v31 = vsel %vm288_vm4, %v1203_v30, 0.0  ;;  %v279_v32 = vpop.f32.mrb[3].mxu1 }
 0x1eb   :  { %v297_v33 = vrot.slane %v296_v31, 4  ;;  %v289_v34 = vsel %vm288_vm4, %v279_v32, 0.0 }
 0x1ec   :  { %v290_v35 = vrot.slane %v289_v34, 4 }
 0x1ed   :  { %v298_v36 = vadd.f32 %v297_v33, %v296_v31  ;;  %v1229_v37 = vpop.f32.mrb[4].mxu1 }
 0x1ee   :  { %v291_v38 = vadd.f32 %v290_v35, %v289_v34  ;;  %v598_v39 = vsel %vm131_vm1, %v1229_v37, 0.0  ;;  %v582_v40 = vpop.f32.mrb[5].mxu1 }
 0x1ef   :  { %v299_v41 = vrot.slane %v298_v36, 2  ;;  %v599_v42 = vrot.slane %v598_v39, 4  ;;  %v591_v43 = vsel %vm131_vm1, %v582_v40, 0.0 }
 0x1f0   :  { %v292_v44 = vrot.slane %v291_v38, 2  ;;  %v592_v45 = vrot.slane %v591_v43, 4 }
 0x1f1   :  { %v300_v46 = vadd.f32 %v299_v41, %v298_v36  ;;  %v600_v47 = vadd.f32 %v599_v42, %v598_v39 }
 0x1f2   :  { %v293_v48 = vadd.f32 %v292_v44, %v291_v38  ;;  %v593_v49 = vadd.f32 %v592_v45, %v591_v43 }
 0x1f3   :  { %v301_v50 = vrot.slane %v300_v46, 1  ;;  %v601_v51 = vrot.slane %v600_v47, 2 }
 0x1f4   :  { %v294_v52 = vrot.slane %v293_v48, 1  ;;  %v594_v53 = vrot.slane %v593_v49, 2 }
 0x1f5   :  { %v302_v54 = vadd.f32 %v301_v50, %v300_v46  ;;  %v602_v55 = vadd.f32 %v601_v51, %v600_v47 }
 0x1f6   :  { %v295_v57 = vadd.f32 %v294_v52, %v293_v48  ;;  %v595_v59 = vadd.f32 %v594_v53, %v593_v49  ;;  %v332_v48 = vld [vmem:[%s1690_s4 + $0x2] sm:$0x3]  ;;  %v331_v49 = vld [vmem:[%s1690_s4] sm:$0x3] }
 0x1f7   :  { %v304_v60 = vmul.f32 0.125, %v302_v54  ;;  %v603_v61 = vrot.slane %v602_v55, 1  ;;  %v340_v50 = vrot.slane %v332_v48, %v1499_v56  ;;  %v336_v52 = vrot.slane %v331_v49, %v1499_v56  ;;  %v634_v53 = vld [vmem:[%s1694_s8 + $0x2] sm:$0x3] }
 0x1f8   :  { %v303_v62 = vmul.f32 0.125, %v295_v57  ;;  %v596_v63 = vrot.slane %v595_v59, 1  ;;  %v350_v57 = vrot.slane %v332_v48, %v1504_v58 }
 0x1f9   :  { %v306_v0 = vsub.f32 %v1203_v30, %v304_v60  ;;  %v604_v1 = vadd.f32 %v603_v61, %v602_v55  ;;  %v346_v61 = vrot.slane %v331_v49, %v1504_v58 }
 0x1fa   :  { %v305_v3 = vsub.f32 %v279_v32, %v303_v62  ;;  %v597_v5 = vadd.f32 %v596_v63, %v595_v59  ;;  %v633_v59 = vld [vmem:[%s1694_s8] sm:$0x3]  ;;  %v642_v63 = vrot.slane %v634_v53, %v1499_v56 }
 0x1fb   :  { %v308_v6 = vmul.f32 %v306_v0, %v306_v0  ;;  %v606_v7 = vmul.f32 0.125, %v604_v1 }
 0x1fc   :  { %v307_v8 = vmul.f32 %v305_v3, %v305_v3  ;;  %v605_v9 = vmul.f32 0.125, %v597_v5 }
 0x1fd   :  { %v316_v10 = vsel %vm288_vm4, %v308_v6, 0.0  ;;  %v608_v11 = vsub.f32 %v1229_v37, %v606_v7  ;;  %v638_v6 = vrot.slane %v633_v59, %v1499_v56 }
 0x1fe   :  { %v317_v12 = vrot.slane %v316_v10, 4  ;;  %v309_v14 = vsel %vm288_vm4, %v307_v8, 0.0  ;;  %v607_v15 = vsub.f32 %v582_v40, %v605_v9 }
 0x1ff   :  { %v310_v16 = vrot.slane %v309_v14, 4  ;;  %v610_v17 = vmul.f32 %v608_v11, %v608_v11 }
 0x200   :  { %v318_v13 = vadd.f32 %v317_v12, %v316_v10  ;;  %v609_v2 = vmul.f32 %v607_v15, %v607_v15  ;;  %v648_v12 = vrot.slane %v633_v59, %v1504_v58 }
 0x201   :  { %v311_v4 = vadd.f32 %v310_v16, %v309_v14  ;;  %v618_v18 = vsel %vm131_vm1, %v610_v17, 0.0 }
 0x202   :  { %v319_v19 = vrot.slane %v318_v13, 2  ;;  %v619_v20 = vrot.slane %v618_v18, 4  ;;  %v611_v21 = vsel %vm131_vm1, %v609_v2, 0.0 }
 0x203   :  { %v312_v22 = vrot.slane %v311_v4, 2  ;;  %v612_v23 = vrot.slane %v611_v21, 4 }
 0x204   :  { %v320_v24 = vadd.f32 %v319_v19, %v318_v13  ;;  %v620_v25 = vadd.f32 %v619_v20, %v618_v18 }
 0x205   :  { %v313_v26 = vadd.f32 %v312_v22, %v311_v4  ;;  %v613_v27 = vadd.f32 %v612_v23, %v611_v21  ;;  %v816_v22 = vld [vmem:[%s1697_s11] sm:$0xff]  ;;  %v817_v23 = vld [vmem:[%s1697_s11 + $0x8] sm:$0xff] }
 0x206   :  { %v321_v28 = vrot.slane %v320_v24, 1  ;;  %v621_v29 = vrot.slane %v620_v25, 2 }
 0x207   :  { %v314_v30 = vrot.slane %v313_v26, 1  ;;  %v614_v31 = vrot.slane %v613_v27, 2 }
 0x208   :  { %v322_v32 = vadd.f32 %v321_v28, %v320_v24  ;;  %v622_v33 = vadd.f32 %v621_v29, %v620_v25  ;;  %v1310_v24 = vpack.c.bf16 %v817_v23, %v816_v22  ;;  %v818_v25 = vld [vmem:[%s1697_s11 + $0x10] sm:$0xff]  ;;  %v820_v28 = vld [vmem:[%s1697_s11 + $0x20] sm:$0xff]  ;;  %v821_v29 = vld [vmem:[%s1697_s11 + $0x28] sm:$0xff] }
 0x209   :  { %v315_v34 = vadd.f32 %v314_v30, %v313_v26  ;;  %v615_v35 = vadd.f32 %v614_v31, %v613_v27  ;;  %v819_v26 = vld [vmem:[%s1697_s11 + $0x18] sm:$0xff]  ;;  %v1318_v30 = vpack.c.bf16 %v821_v29, %v820_v28  ;;  %v822_v31 = vld [vmem:[%s1697_s11 + $0x30] sm:$0xff] }
 0x20a   :  { %v324_v36 = vmul.f32 0.125, %v322_v32  ;;  %v623_v37 = vrot.slane %v622_v33, 1  ;;  %1311 = vmatprep.subr.bf16.mxu0 %v1310_v24  ;;  %v1314_v27 = vpack.c.bf16 %v819_v26, %v818_v25  ;;  %v823_v32 = vld [vmem:[%s1697_s11 + $0x38] sm:$0xff] }
 0x20b   :  { %v323_v38 = vmul.f32 0.125, %v315_v34  ;;  %v616_v39 = vrot.slane %v615_v35, 1 }
 0x20c   :  { %v326_v40 = vadd.f32 1e-05, %v324_v36  ;;  %v624_v41 = vadd.f32 %v623_v37, %v622_v33  ;;  %v1322_v33 = vpack.c.bf16 %v823_v32, %v822_v31  ;;  %v1379_v32 = vmov 0.0  }
 0x20d   :  { %v325_v42 = vadd.f32 1e-05, %v323_v38  ;;  %v617_v43 = vadd.f32 %v616_v39, %v615_v35  ;;  %1260 = vmatprep.subr.mxu1 %v1379_v32 }
 0x20e   :  { %1335 = vrsqrt.f32 %v326_v40  ;;  %v626_v44 = vmul.f32 0.125, %v624_v41 }
 0x20f   :  { %1337 = vrsqrt.f32 %v325_v42  ;;  %v625_v45 = vmul.f32 0.125, %v617_v43 }
 0x210   :  { %v628_v46 = vadd.f32 1e-05, %v626_v44 }
 0x211   :  { %v627_v47 = vadd.f32 1e-05, %v625_v45 }
 0x212   :  { %1339 = vrsqrt.f32 %v628_v46 }
 0x213   :  { %1341 = vrsqrt.f32 %v627_v47 }
 0x218   :  { %v1336_v51 = vpop.eup %1335 }
 0x219   :  { %v1338_v54 = vpop.eup %1337  ;;  %v330_v55 = vmul.f32 %v1336_v51, %v306_v0  ;;  %v652_v0 = vrot.slane %v634_v53, %v1504_v58 }
 0x21a   :  { %v329_v60 = vmul.f32 %v1338_v54, %v305_v3 }
 0x21b   :  { %v342_v62 = vmul.f32 %v340_v50, %v330_v55 }
 0x21c   :  { %v1340_v1 = vpop.eup %1339  ;;  %v341_v5 = vmul.f32 %v336_v52, %v329_v60 }
 0x21d   :  { %v1342_v7 = vpop.eup %1341  ;;  %v352_v8 = vadd.f32 %v350_v57, %v342_v62  ;;  %v632_v9 = vmul.f32 %v1340_v1, %v608_v11 }
 0x21e   :  { %v631_v10 = vmul.f32 %v1342_v7, %v607_v15  ;;  %v351_v14 = vadd.f32 %v346_v61, %v341_v5 }
 0x21f   :  { %v644_v16 = vmul.f32 %v642_v63, %v632_v9  ;;  %v356_v3 = vmul.f32 0.2, %v352_v8  ;;  %vm354_vm6 = vcmp.ge.f32.partialorder %v352_v8, 0.0 }
 0x220   :  { %v643_v17 = vmul.f32 %v638_v6, %v631_v10  ;;  %vm353_vm5 = vcmp.ge.f32.partialorder %v351_v14, 0.0  ;;  %v355_v13 = vmul.f32 0.2, %v351_v14 }
 0x221   :  { %v654_v2 = vadd.f32 %v652_v0, %v644_v16  ;;  %v358_v19 = vsel %vm354_vm6, %v352_v8, %v356_v3 }
 0x222   :  { %v653_v4 = vadd.f32 %v648_v12, %v643_v17  ;;  %v357_v18 = vsel %vm353_vm5, %v351_v14, %v355_v13 }
 0x223   :  { %1220 = vmatprep.mubr.msk.f32.mxu0 %vm288_vm4, %v357_v18  ;;  %v658_v20 = vmul.f32 0.2, %v654_v2  ;;  %vm656_vm8 = vcmp.ge.f32.partialorder %v654_v2, 0.0 }
 0x224   :  { %1221 = vmatmul.mubr.msk.f32.vlgmr.msra.gmra.mrb[0].mxu0 %vm288_vm4, %v358_v19  ;;  %vm655_vm7 = vcmp.ge.f32.partialorder %v653_v4, 0.0  ;;  %v657_v11 = vmul.f32 0.2, %v653_v4 }
 0x225   :  { %v660_v21 = vsel %vm656_vm8, %v654_v2, %v658_v20  ;;  %1313 = vmatpush3.bf16.msra.mxu0 %v1310_v24  ;;  %v789_v2 = vld [vmem:[%s1696_s10 + $0x2] sm:$0x3] }
 0x226   :  { %v659_v15 = vsel %vm655_vm7, %v653_v4, %v657_v11  ;;  %1315 = vmatprep.subr.bf16.mxu0 %v1314_v27  ;;  %v788_v4 = vld [vmem:[%s1696_s10] sm:$0x3]  ;;  %v797_v18 = vrot.slane %v789_v2, %v1499_v56 }
 0x227   :  { %1238 = vmatprep.mubr.msk.f32.mxu1 %vm131_vm1, %v659_v15  ;;  %v793_v20 = vrot.slane %v788_v4, %v1499_v56  ;;  %v803_v23 = vrot.slane %v788_v4, %v1504_v58 }
 0x228   :  { %1239 = vmatmul.mubr.msk.f32.vlgmr.msra.gmra.mrb[6].mxu1 %vm131_vm1, %v660_v21  ;;  %v807_v21 = vrot.slane %v789_v2, %v1504_v58 }
 0x229   :  { %1317 = vmatpush3.bf16.msra.mxu0 %v1314_v27  ;;  %1262 = vmatprep.mubr.msk.f32.mxu1 %vm1380_vm11, %v1379_v32 }
 0x22a   :  { %1319 = vmatprep.subr.bf16.mxu0 %v1318_v30 }
 0x22d   :  { %1321 = vmatpush3.bf16.msra.mxu0 %v1318_v30 }
 0x22e   :  { %1323 = vmatprep.subr.bf16.mxu0 %v1322_v33 }
 0x231   :  { %1325 = vmatpush3.bf16.msra.mxu0 %v1322_v33 }
 0x2f7   :  { %v1612_v34 = vpop.f32.mrb[0].mxu0 }
 0x2f8   :  { %v1614_v35 = vpop.f32.mrb[1].mxu0 }
 0x2f9   :  { %v448_v33 = vrot.slane %v1614_v35, 4 }
 0x2fb   :  { %v1240_v36 = vpop.f32.mrb[6].mxu1 }
 0x2fc   :  { %v753_v37 = vsel %vm288_vm4, %v1240_v36, 0.0  ;;  %v737_v38 = vpop.f32.mrb[7].mxu1 }
 0x2fd   :  { %v754_v39 = vrot.slane %v753_v37, 4  ;;  %v746_v40 = vsel %vm288_vm4, %v737_v38, 0.0 }
 0x2fe   :  { %v747_v41 = vrot.slane %v746_v40, 4 }
 0x2ff   :  { %v755_v42 = vadd.f32 %v754_v39, %v753_v37  ;;  %v449_v37 = vadd.f32 %v448_v33, %v1614_v35 }
 0x300   :  { %v748_v43 = vadd.f32 %v747_v41, %v746_v40 }
 0x301   :  { %v756_v44 = vrot.slane %v755_v42, 2  ;;  %v450_v39 = vrot.slane %v449_v37, 2 }
 0x302   :  { %v749_v45 = vrot.slane %v748_v43, 2 }
 0x303   :  { %v757_v46 = vadd.f32 %v756_v44, %v755_v42  ;;  %v451_v41 = vadd.f32 %v450_v39, %v449_v37 }
 0x304   :  { %v750_v47 = vadd.f32 %v749_v45, %v748_v43 }
 0x305   :  { %v758_v48 = vrot.slane %v757_v46, 1  ;;  %v452_v43 = vrot.slane %v451_v41, 1 }
 0x306   :  { %v751_v49 = vrot.slane %v750_v47, 1 }
 0x307   :  { %v759_v50 = vadd.f32 %v758_v48, %v757_v46  ;;  %v453_v45 = vadd.f32 %v452_v43, %v451_v41 }
 0x308   :  { %v752_v51 = vadd.f32 %v751_v49, %v750_v47 }
 0x309   :  { %v761_v52 = vmul.f32 0.125, %v759_v50  ;;  %v460_v47 = vmul.f32 0.125, %v453_v45  ;;  %v486_v45 = vld [vmem:[%s1692_s6] sm:$0x3] }
 0x30a   :  { %v760_v53 = vmul.f32 0.125, %v752_v51 }
 0x30b   :  { %v763_v54 = vsub.f32 %v1240_v36, %v761_v52  ;;  %v454_v36 = vrot.slane %v1612_v34, 4  ;;  %v1640_v49 = vsub.f32 %v1614_v35, %v460_v47  ;;  %v487_v47 = vld [vmem:[%s1692_s6 + $0x2] sm:$0x3]  ;;  %s1381_s6 = smov [#allocation2]  }
 0x30c   :  { %v762_v55 = vsub.f32 %v737_v38, %v760_v53 }
 0x30d   :  { %v765_v57 = vmul.f32 %v763_v54, %v763_v54  ;;  %v455_v38 = vadd.f32 %v1612_v34, %v454_v36  ;;  %v464_v51 = vmul.f32 %v1640_v49, %v1640_v49 }
 0x30e   :  { %v764_v59 = vmul.f32 %v762_v55, %v762_v55 }
 0x30f   :  { %v773_v60 = vsel %vm288_vm4, %v765_v57, 0.0  ;;  %v456_v40 = vrot.slane %v455_v38, 2  ;;  %v466_v53 = vrot.slane %v464_v51, 4 }
 0x310   :  { %v774_v61 = vrot.slane %v773_v60, 4  ;;  %v766_v62 = vsel %vm288_vm4, %v764_v59, 0.0 }
 0x311   :  { %v767_v63 = vrot.slane %v766_v62, 4  ;;  %v457_v42 = vadd.f32 %v456_v40, %v455_v38  ;;  %v467_v57 = vadd.f32 %v466_v53, %v464_v51  ;;  %v491_v51 = vrot.slane %v486_v45, %v1499_v56 }
 0x312   :  { %v775_v1 = vadd.f32 %v774_v61, %v773_v60 }
 0x313   :  { %v768_v5 = vadd.f32 %v767_v63, %v766_v62  ;;  %v458_v44 = vrot.slane %v457_v42, 1 }
 0x314   :  { %v776_v6 = vrot.slane %v775_v1, 2 }
 0x315   :  { %v769_v7 = vrot.slane %v768_v5, 2  ;;  %v459_v46 = vadd.f32 %v458_v44, %v457_v42 }
 0x316   :  { %v777_v8 = vadd.f32 %v776_v6, %v775_v1  ;;  %v468_v1 = vrot.slane %v467_v57, 2 }
 0x317   :  { %v770_v9 = vadd.f32 %v769_v7, %v768_v5  ;;  %v461_v48 = vmul.f32 0.125, %v459_v46  ;;  %v944_v46 = vld [vmem:[%s1698_s12 + $0x2] sm:$0x3] }
 0x318   :  { %v778_v0 = vrot.slane %v777_v8, 1 }
 0x319   :  { %v771_v10 = vrot.slane %v770_v9, 1  ;;  %v1643_v50 = vsub.f32 %v1612_v34, %v461_v48 }
 0x31a   :  { %v779_v12 = vadd.f32 %v778_v0, %v777_v8 }
 0x31b   :  { %v772_v14 = vadd.f32 %v771_v10, %v770_v9  ;;  %v465_v52 = vmul.f32 %v1643_v50, %v1643_v50  ;;  %v469_v9 = vadd.f32 %v468_v1, %v467_v57  ;;  %v495_v57 = vrot.slane %v487_v47, %v1499_v56 }
 0x31c   :  { %v781_v16 = vmul.f32 0.125, %v779_v12 }
 0x31d   :  { %v780_v3 = vmul.f32 0.125, %v772_v14 }
 0x31e   :  { %v783_v17 = vadd.f32 1e-05, %v781_v16 }
 0x31f   :  { %v782_v13 = vadd.f32 1e-05, %v780_v3  ;;  %v470_v3 = vrot.slane %v469_v9, 1 }
 0x320   :  { %1343 = vrsqrt.f32 %v783_v17 }
 0x321   :  { %1345 = vrsqrt.f32 %v782_v13 }
 0x32a   :  { %v1344_v19 = vpop.eup %1343 }
 0x32b   :  { %v1346_v11 = vpop.eup %1345  ;;  %v787_v15 = vmul.f32 %v1344_v19, %v763_v54  ;;  %v471_v19 = vadd.f32 %v470_v3, %v469_v9  ;;  %v505_v9 = vrot.slane %v487_v47, %v1504_v58 }
 0x32c   :  { %v786_v22 = vmul.f32 %v1346_v11, %v762_v55  ;;  %v472_v55 = vrot.slane %v465_v52, 4 }
 0x32d   :  { %v799_v24 = vmul.f32 %v797_v18, %v787_v15 }
 0x32e   :  { %v798_v25 = vmul.f32 %v793_v20, %v786_v22  ;;  %v473_v35 = vadd.f32 %v472_v55, %v465_v52  ;;  %v943_v52 = vld [vmem:[%s1698_s12] sm:$0x3]  ;;  %s1119_s12 = sshll.u32 %s1381_s6, 4  ;;  %s1120_s12 = int_to_ptr.vmem [resolvable:$true] %s1119_s12 }
 0x32f   :  { %v809_v26 = vadd.f32 %v807_v21, %v799_v24  ;;  %v958_v1 = vrot.slane %v943_v52, %v1504_v58  ;;  %s1355_s4 = scalar_lea.vmem %s1120_s12, 256  ;;  %p1360_p1 = scmp.lt.s32.totalorder %s1120_s12, %s1120_s12 }
 0x330   :  { %v808_v27 = vadd.f32 %v803_v23, %v798_v25  ;;  %v474_v8 = vrot.slane %v473_v35, 2  ;;  %v478_v23 = vmul.f32 0.125, %v471_v19  ;;  %p1356_p0 = scmp.ne.s32.totalorder %s1120_s12, %s1355_s4  ;;  %p1361_p2 = scmp.lt.s32.totalorder %s1355_s4, %s1355_s4 }
 0x331   :  { %v813_v28 = vmul.f32 0.2, %v809_v26  ;;  %vm811_vm10 = vcmp.ge.f32.partialorder %v809_v26, 0.0 }
 0x332   :  { %vm810_vm9 = vcmp.ge.f32.partialorder %v808_v27, 0.0  ;;  %v812_v29 = vmul.f32 0.2, %v808_v27  ;;  %v475_v16 = vadd.f32 %v474_v8, %v473_v35  ;;  %p1362_p3 = por %p1361_p2, %p1360_p1 }
 0x333   :  { %v815_v31 = vsel %vm811_vm10, %v809_v26, %v813_v28 }
 0x334   :  { %v814_v30 = vsel %vm810_vm9, %v808_v27, %v812_v29  ;;  %v476_v18 = vrot.slane %v475_v16, 1  ;;  %v480_v29 = vadd.f32 1e-05, %v478_v23  ;;  %p1363_p4 = pnand %p1362_p3, %p1356_p0 }
 0x335   :  { %1257 = vmatprep.mubr.msk.f32.mxu0 %vm288_vm4, %v814_v30 }
 0x336   :  { %1258 = vmatmul.mubr.msk.f32.vlgmr.msra.gmra.mrb[2].mxu0 %vm288_vm4, %v815_v31  ;;  %v477_v22 = vadd.f32 %v476_v18, %v475_v16  ;;  %1347 = vrsqrt.f32 %v480_v29 }
 0x338   :  { %v479_v28 = vmul.f32 0.125, %v477_v22 }
 0x33a   :  { %v481_v37 = vadd.f32 1e-05, %v479_v28 }
 0x33c   :  { %1349 = vrsqrt.f32 %v481_v37 }
 0x340   :  { %v1348_v44 = vpop.eup %1347 }
 0x341   :  { %v484_v48 = vmul.f32 %v1348_v44, %v1640_v49  ;;  %v501_v49 = vrot.slane %v486_v45, %v1504_v58 }
 0x346   :  { %v1350_v53 = vpop.eup %1349 }
 0x409   :  { %v1259_v54 = vpop.f32.mrb[2].mxu0 }
 0x40a   :  { %v911_v59 = vrot.slane %v1259_v54, 4  ;;  %v896_v60 = vpop.f32.mrb[3].mxu0 }
 0x40b   :  { %v905_v61 = vrot.slane %v896_v60, 4 }
 0x40c   :  { %v912_v62 = vadd.f32 %v1259_v54, %v911_v59  ;;  %v948_v59 = vrot.slane %v943_v52, %v1499_v56 }
 0x40d   :  { %v906_v63 = vadd.f32 %v905_v61, %v896_v60  ;;  %v485_v61 = vmul.f32 %v1350_v53, %v1643_v50 }
 0x40e   :  { %v913_v5 = vrot.slane %v912_v62, 2 }
 0x40f   :  { %v907_v34 = vrot.slane %v906_v63, 2 }
 0x410   :  { %v914_v6 = vadd.f32 %v913_v5, %v912_v62  ;;  %v496_v62 = vmul.f32 %v491_v51, %v484_v48  ;;  %v962_v5 = vrot.slane %v944_v46, %v1504_v58 }
 0x411   :  { %v908_v7 = vadd.f32 %v907_v34, %v906_v63 }
 0x412   :  { %v915_v0 = vrot.slane %v914_v6, 1  ;;  %v506_v8 = vadd.f32 %v501_v49, %v496_v62 }
 0x413   :  { %v909_v10 = vrot.slane %v908_v7, 1 }
 0x414   :  { %v916_v12 = vadd.f32 %v915_v0, %v914_v6  ;;  %v510_v50 = vmul.f32 0.2, %v506_v8  ;;  %vm508_vm13 = vcmp.ge.f32.partialorder %v506_v8, 0.0 }
 0x415   :  { %v910_v14 = vadd.f32 %v909_v10, %v908_v7  ;;  %v497_v7 = vmul.f32 %v495_v57, %v485_v61 }
 0x416   :  { %v918_v17 = vmul.f32 0.125, %v916_v12  ;;  %v512_v3 = vsel %vm508_vm13, %v506_v8, %v510_v50 }
 0x417   :  { %v917_v13 = vmul.f32 0.125, %v910_v14  ;;  %v507_v12 = vadd.f32 %v505_v9, %v497_v7 }
 0x418   :  { %v920_v2 = vsub.f32 %v1259_v54, %v918_v17  ;;  %v952_v54 = vrot.slane %v944_v46, %v1499_v56 }
 0x419   :  { %v919_v4 = vsub.f32 %v896_v60, %v917_v13  ;;  %v511_v17 = vmul.f32 0.2, %v507_v12  ;;  %vm509_vm15 = vcmp.ge.f32.partialorder %v507_v12, 0.0 }
 0x41a   :  { %v922_v20 = vmul.f32 %v920_v2, %v920_v2 }
 0x41b   :  { %v921_v11 = vmul.f32 %v919_v4, %v919_v4  ;;  %v513_v58 = vsel %vm509_vm15, %v507_v12, %v511_v17 }
 0x41c   :  { %v929_v15 = vrot.slane %v922_v20, 4 }
 0x41d   :  { %v923_v21 = vrot.slane %v921_v11, 4 }
 0x41e   :  { %v930_v24 = vadd.f32 %v929_v15, %v922_v20 }
 0x41f   :  { %v924_v25 = vadd.f32 %v923_v21, %v921_v11 }
 0x420   :  { %v931_v26 = vrot.slane %v930_v24, 2 }
 0x421   :  { %v925_v27 = vrot.slane %v924_v25, 2 }
 0x422   :  { %v932_v30 = vadd.f32 %v931_v26, %v930_v24 }
 0x423   :  { %v926_v31 = vadd.f32 %v925_v27, %v924_v25 }
 0x424   :  { %v933_v33 = vrot.slane %v932_v30, 1 }
 0x425   :  { %v927_v36 = vrot.slane %v926_v31, 1 }
 0x426   :  { %v934_v38 = vadd.f32 %v933_v33, %v932_v30 }
 0x427   :  { %v928_v39 = vadd.f32 %v927_v36, %v926_v31 }
 0x428   :  { %v936_v40 = vmul.f32 0.125, %v934_v38 }
 0x429   :  { %v935_v41 = vmul.f32 0.125, %v928_v39 }
 0x42a   :  { %v938_v42 = vadd.f32 1e-05, %v936_v40 }
 0x42b   :  { %v937_v43 = vadd.f32 1e-05, %v935_v41 }
 0x42c   :  { %1351 = vrsqrt.f32 %v938_v42 }
 0x42d   :  { %1353 = vrsqrt.f32 %v937_v43 }
 0x436   :  { %v1352_v55 = vpop.eup %1351 }
 0x437   :  { %v1354_v60 = vpop.eup %1353  ;;  %v942_v63 = vmul.f32 %v1352_v55, %v920_v2 }
 0x438   :  { %v941_v35 = vmul.f32 %v1354_v60, %v919_v4 }
 0x439   :  { %v954_v34 = vmul.f32 %v952_v54, %v942_v63 }
 0x43a   :  { %v953_v6 = vmul.f32 %v948_v59, %v941_v35 }
 0x43b   :  { %v964_v56 = vadd.f32 %v962_v5, %v954_v34 }
 0x43c   :  { %v963_v0 = vadd.f32 %v958_v1, %v953_v6 }
 0x43d   :  { %v968_v16 = vmul.f32 0.2, %v964_v56  ;;  %vm966_vm14 = vcmp.ge.f32.partialorder %v964_v56, 0.0 }
 0x43e   :  { %vm965_vm12 = vcmp.ge.f32.partialorder %v963_v0, 0.0  ;;  %v967_v10 = vmul.f32 0.2, %v963_v0 }
 0x43f   :  { %v970_v13 = vsel %vm966_vm14, %v964_v56, %v968_v16 }
 0x440   :  { %v969_v14 = vsel %vm965_vm12, %v963_v0, %v967_v10 }
 0x441   :  { %1261 = vmatpush3.xpose.msra.mxu1 %v969_v14 }
 0x442   :  { %1265 = vmatprep.subr.mxu1 %v1379_v32 }
 0x444   :  { %1263 = vmatmul.mubr.f32.vlgmr.msra.gmra.mrb[8].mxu1 %v512_v3 }
 0x445   :  { %1266 = vmatpush3.xpose.msra.mxu1 %v970_v13  ;;  %1267 = vmatprep.mubr.msk.f32.mxu1 %vm1380_vm11, %v1379_v32 }
 0x448   :  { %1268 = vmatmul.mubr.f32.vlgmr.msra.gmra.mrb[10].mxu1 %v513_v58 }
 0x517   :  { %v1037_v2 = vpop.f32.mrb[8].mxu1 }
 0x518   :  { %1112 = vst.msk [vmem:[#allocation2] sm:$0xff] %vm1111_vm0, %v1037_v2  ;;  %v1264_v4 = vpop.f32.mrb[9].mxu1 }
 0x51b   :  { %v1107_v18 = vpop.f32.mrb[10].mxu1 }
 0x51c   :  { %1113 = vst.msk [vmem:[#allocation2 + $0x8] sm:$0xff] %vm1111_vm0, %v1107_v18  ;;  %v1269_v19 = vpop.f32.mrb[11].mxu1 }
 0x51d   :  { %1366 = shalt.err (!%p1363_p4)
}
 0x51e   :  { %s1367_s18 = scalar_lea.hbm %s1699_s13, 256 }
 0x51f   :  { %p1368_p5 = scmp.ne.s32.totalorder %s1699_s13, %s1367_s18  ;;  %p1371_p6 = scmp.lt.u32.totalorder %s1367_s18, %s1699_s13 }
 0x521   :  { %p1373_p7 = pnand %p1371_p6, %p1368_p5 }
 0x523   :  { %1376 = shalt.err (!%p1373_p7)
}
 0x524   :  { %s1382_s22 = smov 128   ;;  %s1383_s23 = smov 8  }
 0x525   :  { %1125 = dma.vmem_to_hbm [thread:$0]  %s1120_s12, 256, %s1699_s13, [#allocation3], %s1382_s22, %s1382_s22, %s1383_s23  }
 0x526   :  { %1377 = dma.done.wait [#allocation3], 256  }
 0x527   :  { %1378 = vsyncadd [#allocation3], 4294967040 }
 0x528   :  { %1129 = vsyncpa [#allocation3], 1 }

</bundles_post_ra>
